<compile_context>
chip_gen: v7x
topology: tpu7x:2x2x1
jax: 0.10.0
libtpu: 0.0.40
codegen_flags: <defaults>
</compile_context>

<pallas_src>
import functools

import jax
import jax.numpy as jnp
from jax.experimental import pallas as pl
from jax.experimental.pallas import tpu as pltpu


def _round_up(x, m):
    return ((x + m - 1) // m) * m


# ----------------------------- Pass 1 kernel --------------------------------
# For row tile i:
#   H1_i = relu( sum_k A[i,k] @ XW1[k] + b1 )          (f32 accumulator)
#   partial[i] = PA[:, i] @ H1_i                       (fused pooled partial)
def gcn_fused_kernel(a_ref, xw1_ref, b1_ref, pa_ref, part_ref, acc_ref,
                     *, tile_n, xw1_resident):
    k = pl.program_id(1)

    @pl.when(k == 0)
    def _():
        acc_ref[...] = jnp.zeros_like(acc_ref)

    if xw1_resident:
        # XW1 lives fully in VMEM (fetched once); slice the k-th node block.
        start = pl.multiple_of(k * tile_n, tile_n)
        xw1_blk = xw1_ref[pl.ds(start, tile_n), :]
    else:
        xw1_blk = xw1_ref[...]

    acc_ref[...] += jnp.dot(a_ref[...], xw1_blk,
                            preferred_element_type=jnp.float32)

    @pl.when(k == pl.num_programs(1) - 1)
    def _():
        h1 = jnp.maximum(acc_ref[...] + b1_ref[...], 0.0).astype(jnp.bfloat16)
        part = jnp.dot(pa_ref[...], h1, preferred_element_type=jnp.float32)
        part_ref[...] = part.reshape(part_ref.shape)


# ----------------------------- Pass 2 kernel --------------------------------
# out = sigmoid( (sum_i partial[i]) @ W2 + b2 )   -- tiny: G_pad x H_pad.
def head_kernel(part_ref, w2_ref, b2_ref, o_ref):
    pooled = jnp.sum(part_ref[...], axis=0)                    # [G_pad, H_pad] f32
    logits = jnp.dot(pooled.astype(jnp.bfloat16), w2_ref[...],
                     preferred_element_type=jnp.float32) + b2_ref[...]
    o_ref[...] = 1.0 / (1.0 + jnp.exp(-logits))                # exact sigmoid


# ------------------------------- Wrapper -------------------------------------
@functools.partial(jax.jit, static_argnames=("num_graphs", "tile_n"))
def gnn_forward(x, edge_index, batch, params, num_graphs, tile_n=256):
    """x: [N, F_in] f32, edge_index: [2, E] i32, batch: [N] i32 graph ids."""
    w1, b1, w2, b2 = params
    N, F_in = x.shape
    H = w1.shape[1]
    O = w2.shape[1]
    assert tile_n % 128 == 0

    N_pad = _round_up(N, tile_n)
    H_pad = _round_up(H, 128)
    O_pad = _round_up(O, 128)
    G_pad = _round_up(num_graphs, 8)
    R = N_pad // tile_n

    # ---- GCN symmetric normalization with self-loops: D^-1/2 (A+I) D^-1/2 ----
    src = edge_index[0]
    dst = edge_index[1]
    loop = jnp.arange(N, dtype=edge_index.dtype)
    src = jnp.concatenate([src, loop])
    dst = jnp.concatenate([dst, loop])
    deg = jnp.zeros((N,), jnp.float32).at[dst].add(1.0)
    dinv = jnp.where(deg > 0, jax.lax.rsqrt(deg), 0.0)
    edge_w = dinv[src] * dinv[dst]

    # Dense normalized adjacency built directly into the padded bf16 buffer
    # (single N^2 zero-fill + E-sized scatter; no f32 build / pad / cast passes).
    # TODO(synk): for very large N replace the dense A with a scalar-prefetched
    # edge-list kernel instead of an O(N^2) buffer.
    a_bf = jnp.zeros((N_pad, N_pad), jnp.bfloat16).at[dst, src].add(
        edge_w.astype(jnp.bfloat16))

    # ---- pooled adjacency PA = P @ A_hat from the edge list (E-sized scatter) ----
    counts = jnp.zeros((num_graphs,), jnp.float32).at[batch].add(1.0)
    inv_cnt = jnp.where(counts > 0, 1.0 / counts, 0.0)
    g_dst = batch[dst]
    pa = jnp.zeros((G_pad, N_pad), jnp.float32).at[g_dst, src].add(
        edge_w * inv_cnt[g_dst])
    pa_bf = pa.astype(jnp.bfloat16)

    # ---- fold W1: XW1 = X @ W1 (exactly GCNConv's internal linear) ----
    xw1 = jnp.dot(x.astype(jnp.bfloat16), w1.astype(jnp.bfloat16),
                  preferred_element_type=jnp.float32).astype(jnp.bfloat16)
    xw1_bf = jnp.pad(xw1, ((0, N_pad - N), (0, H_pad - H)))

    b1_p = jnp.pad(b1.reshape(1, -1), ((0, 0), (0, H_pad - H)))          # f32
    w2_bf = jnp.pad(w2, ((0, H_pad - H), (0, O_pad - O))).astype(jnp.bfloat16)
    b2_p = jnp.pad(b2.reshape(1, -1), ((0, 0), (0, O_pad - O)))          # f32

    # Conservative scoped VMEM limit: fits v7x's 64 MiB physical; raise on
    # v5e/v6e (128 MiB) if tiles / residency are grown further.
    vmem_limit = 48 * 1024 * 1024

    # Hold XW1 resident in VMEM when small enough (loaded once instead of
    # being re-streamed once per row tile); conservative so 2x-buffering plus
    # A tiles stay well under the limit on v7x.
    xw1_resident = (N_pad * H_pad * 2) <= 12 * 1024 * 1024
    if xw1_resident:
        xw1_spec = pl.BlockSpec((N_pad, H_pad), lambda i, k: (0, 0))
    else:
        xw1_spec = pl.BlockSpec((tile_n, H_pad), lambda i, k: (k, 0))

    kernel1 = functools.partial(gcn_fused_kernel, tile_n=tile_n,
                                xw1_resident=xw1_resident)

    # ---- pass 1: per-row-tile H1 with fused pooled partials ----
    partials = pl.pallas_call(
        kernel1,
        out_shape=jax.ShapeDtypeStruct((R, G_pad, H_pad), jnp.float32),
        grid_spec=pltpu.PrefetchScalarGridSpec(
            num_scalar_prefetch=0,
            grid=(R, R),
            in_specs=[
                pl.BlockSpec((tile_n, tile_n), lambda i, k: (i, k)),   # A
                xw1_spec,                                              # XW1
                pl.BlockSpec((1, H_pad), lambda i, k: (0, 0)),         # b1
                pl.BlockSpec((G_pad, tile_n), lambda i, k: (0, i)),    # PA
            ],
            out_specs=pl.BlockSpec((1, G_pad, H_pad), lambda i, k: (i, 0, 0)),
            scratch_shapes=[pltpu.VMEM((tile_n, H_pad), jnp.float32)],
        ),
        compiler_params=pltpu.CompilerParams(
            dimension_semantics=("parallel", "arbitrary"),
            vmem_limit_bytes=vmem_limit,
        ),
    )(a_bf, xw1_bf, b1_p, pa_bf)

    # ---- pass 2: out = sigmoid((sum_i partial[i]) @ W2 + b2) ----
    out_pad = pl.pallas_call(
        head_kernel,
        out_shape=jax.ShapeDtypeStruct((G_pad, O_pad), jnp.float32),
        grid_spec=pltpu.PrefetchScalarGridSpec(
            num_scalar_prefetch=0,
            grid=(1,),
            in_specs=[
                pl.BlockSpec((R, G_pad, H_pad), lambda i: (0, 0, 0)),  # partials
                pl.BlockSpec((H_pad, O_pad), lambda i: (0, 0)),        # W2
                pl.BlockSpec((1, O_pad), lambda i: (0, 0)),            # b2
            ],
            out_specs=pl.BlockSpec((G_pad, O_pad), lambda i: (0, 0)),
        ),
        compiler_params=pltpu.CompilerParams(
            dimension_semantics=("arbitrary",),
            vmem_limit_bytes=vmem_limit,
        ),
    )(partials, w2_bf, b2_p)

    return out_pad[:num_graphs, :O]


def init_params(key, input_dim, hidden_dim, output_dim):
    k1, k2 = jax.random.split(key)
    # Glorot-uniform-ish deterministic init (like PyG GCNConv default), zero bias.
    lim1 = (6.0 / (input_dim + hidden_dim)) ** 0.5
    lim2 = (6.0 / (hidden_dim + output_dim)) ** 0.5
    w1 = jax.random.uniform(k1, (input_dim, hidden_dim), jnp.float32, -lim1, lim1)
    b1 = jnp.zeros((hidden_dim,), jnp.float32)
    w2 = jax.random.uniform(k2, (hidden_dim, output_dim), jnp.float32, -lim2, lim2)
    b2 = jnp.zeros((output_dim,), jnp.float32)
    return w1, b1, w2, b2


if __name__ == "__main__":
    key = jax.random.PRNGKey(0)
    k_x, k_p = jax.random.split(key)

    # Small synthetic graph batch: 16 nodes, 2 graphs of 8 nodes each.
    N, input_dim, hidden_dim, output_dim = 16, 8, 32, 8
    num_graphs = 2

    x = jax.random.normal(k_x, (N, input_dim), jnp.float32)

    # ring edges inside each graph (both directions), deterministic
    src_list, dst_list = [], []
    for g in range(num_graphs):
        base = g * 8
        for i in range(8):
            a, b = base + i, base + (i + 1) % 8
            src_list += [a, b]
            dst_list += [b, a]
    edge_index = jnp.array([src_list, dst_list], dtype=jnp.int32)  # [2, E]
    batch = jnp.array([0] * 8 + [1] * 8, dtype=jnp.int32)          # [N]

    params = init_params(k_p, input_dim, hidden_dim, output_dim)

    out = gnn_forward(x, edge_index, batch, params, num_graphs=num_graphs)
    jax.block_until_ready(out)

    assert out.shape == (num_graphs, output_dim)
    assert bool(jnp.all(jnp.isfinite(out)))
    assert bool(jnp.all((out > 0.0) & (out < 1.0)))  # sigmoid range
    print("KERNEL_OK")
</pallas_src>

<mosaic_0001>
module attributes {stable_mosaic.version = 11 : i64} {
  func.func private @main(%arg0: i32) attributes {dimension_semantics = [#tpu.dimension_semantics<core_parallel>], iteration_bounds = array<i64: 2>, tpu.core_type = #tpu.core_type<sc_scalar_subcore>, window_params = []} {
    return
  }
}

module attributes {stable_mosaic.version = 11 : i64} {
  func.func private @main(%arg0: i32) attributes {dimension_semantics = [#tpu.dimension_semantics<core_parallel>], iteration_bounds = array<i64: 2>, tpu.core_type = #tpu.core_type<sc_scalar_subcore>, window_params = []} {
    return
  }
}

module attributes {stable_mosaic.version = 11 : i64} {
  func.func @head_kernel(%arg0: i32, %arg1: memref<1x8x128xf32, #tpu.memory_space<vmem>>, %arg2: memref<128x128xbf16, #tpu.memory_space<vmem>>, %arg3: memref<1x128xf32, #tpu.memory_space<vmem>>, %arg4: memref<8x128xf32, #tpu.memory_space<vmem>>) attributes {dimension_semantics = [#tpu.dimension_semantics<arbitrary>], iteration_bounds = array<i64: 1>, scalar_prefetch = 0 : i64, scratch_operands = 0 : i64, tpu.core_type = #tpu.core_type<tc>, window_params = [{pipeline_mode = #tpu.pipeline_mode<synchronous>, transform_indices = @transform_0, window_bounds = array<i64: 1, 8, 128>}, {pipeline_mode = #tpu.pipeline_mode<synchronous>, transform_indices = @transform_1, window_bounds = array<i64: 128, 128>}, {pipeline_mode = #tpu.pipeline_mode<synchronous>, transform_indices = @transform_2, window_bounds = array<i64: 1, 128>}, {pipeline_mode = #tpu.pipeline_mode<synchronous>, transform_indices = @transform_3, window_bounds = array<i64: 8, 128>}]} {
    %c0 = arith.constant 0 : index
    %c0_0 = arith.constant 0 : index
    %c0_1 = arith.constant 0 : index
    %0 = vector.load %arg1[%c0, %c0_0, %c0_1] : memref<1x8x128xf32, #tpu.memory_space<vmem>>, vector<1x8x128xf32>
    %cst = arith.constant dense<0.000000e+00> : vector<8x128xf32>
    %1 = vector.multi_reduction <add>, %0, %cst [0] : vector<1x8x128xf32> to vector<8x128xf32>
    %2 = arith.truncf %1 : vector<8x128xf32> to vector<8x128xbf16>
    %c0_2 = arith.constant 0 : index
    %c0_3 = arith.constant 0 : index
    %3 = vector.load %arg2[%c0_2, %c0_3] : memref<128x128xbf16, #tpu.memory_space<vmem>>, vector<128x128xbf16>
    %cst_4 = arith.constant dense<0.000000e+00> : vector<8x128xf32>
    %4 = tpu.matmul %2, %3, %cst_4 {dimension_numbers = #tpu.dot_dimension_numbers<[1], [0], [0], [1], [0, 0, 1, 1], [], []>} : vector<8x128xbf16>, vector<128x128xbf16>, vector<8x128xf32> -> vector<8x128xf32>
    %c0_5 = arith.constant 0 : index
    %c0_6 = arith.constant 0 : index
    %5 = vector.load %arg3[%c0_5, %c0_6] : memref<1x128xf32, #tpu.memory_space<vmem>>, vector<1x128xf32>
    %6 = vector.broadcast %5 : vector<1x128xf32> to vector<8x128xf32>
    %7 = arith.addf %4, %6 : vector<8x128xf32>
    %cst_7 = arith.constant 0.000000e+00 : f32
    %8 = vector.broadcast %cst_7 : f32 to vector<8x128xf32>
    %9 = arith.subf %8, %7 : vector<8x128xf32>
    %10 = math.exp %9 : vector<8x128xf32>
    %cst_8 = arith.constant 1.000000e+00 : f32
    %11 = vector.broadcast %cst_8 : f32 to vector<8x128xf32>
    %12 = arith.addf %11, %10 : vector<8x128xf32>
    %cst_9 = arith.constant 1.000000e+00 : f32
    %13 = vector.broadcast %cst_9 : f32 to vector<8x128xf32>
    %14 = arith.divf %13, %12 : vector<8x128xf32>
    %c0_10 = arith.constant 0 : index
    %c0_11 = arith.constant 0 : index
    %15 = vector.load %arg4[%c0_10, %c0_11] : memref<8x128xf32, #tpu.memory_space<vmem>>, vector<8x128xf32>
    tpu.vector_store %arg4[%c0_10, %c0_11], %14 {strides = array<i32>} : memref<8x128xf32, #tpu.memory_space<vmem>>, vector<8x128xf32>,
    return
  }
  func.func @transform_0(%arg0: i32) -> (i32, i32, i32) {
    %c0_i32 = arith.constant 0 : i32
    %c0_i32_0 = arith.constant 0 : i32
    %c0_i32_1 = arith.constant 0 : i32
    %c0_i32_2 = arith.constant 0 : i32
    return %c0_i32, %c0_i32_0, %c0_i32_1 : i32, i32, i32
  }
  func.func @transform_1(%arg0: i32) -> (i32, i32) {
    %c0_i32 = arith.constant 0 : i32
    %c0_i32_0 = arith.constant 0 : i32
    %c0_i32_1 = arith.constant 0 : i32
    return %c0_i32, %c0_i32_0 : i32, i32
  }
  func.func @transform_2(%arg0: i32) -> (i32, i32) {
    %c0_i32 = arith.constant 0 : i32
    %c0_i32_0 = arith.constant 0 : i32
    %c0_i32_1 = arith.constant 0 : i32
    return %c0_i32, %c0_i32_0 : i32, i32
  }
  func.func @transform_3(%arg0: i32) -> (i32, i32) {
    %c0_i32 = arith.constant 0 : i32
    %c0_i32_0 = arith.constant 0 : i32
    %c0_i32_1 = arith.constant 0 : i32
    return %c0_i32, %c0_i32_0 : i32, i32
  }
}

module attributes {stable_mosaic.version = 11 : i64} {
  func.func @gcn_fused_kernel(%arg0: i32, %arg1: i32, %arg2: memref<256x256xbf16, #tpu.memory_space<vmem>>, %arg3: memref<256x128xbf16, #tpu.memory_space<vmem>>, %arg4: memref<1x128xf32, #tpu.memory_space<vmem>>, %arg5: memref<8x256xbf16, #tpu.memory_space<vmem>>, %arg6: memref<1x8x128xf32, #tpu.memory_space<vmem>>, %arg7: memref<256x128xf32, #tpu.memory_space<vmem>>) attributes {dimension_semantics = [#tpu.dimension_semantics<parallel>, #tpu.dimension_semantics<arbitrary>], iteration_bounds = array<i64: 1, 1>, scalar_prefetch = 0 : i64, scratch_operands = 1 : i64, tpu.core_type = #tpu.core_type<tc>, window_params = [{transform_indices = @transform_0, window_bounds = array<i64: 256, 256>}, {pipeline_mode = #tpu.pipeline_mode<synchronous>, transform_indices = @transform_1, window_bounds = array<i64: 256, 128>}, {pipeline_mode = #tpu.pipeline_mode<synchronous>, transform_indices = @transform_2, window_bounds = array<i64: 1, 128>}, {transform_indices = @transform_3, window_bounds = array<i64: 8, 256>}, {transform_indices = @transform_4, window_bounds = array<i64: 1, 8, 128>}]} {
    %c0_i32 = arith.constant 0 : i32
    %0 = arith.cmpi eq, %arg1, %c0_i32 : i32
    %1 = arith.extui %0 : i1 to i32
    %c0_i32_0 = arith.constant 0 : i32
    %2 = arith.cmpi ne, %1, %c0_i32_0 : i32
    scf.if %2 {
      %cst_9 = arith.constant 0.000000e+00 : f32
      %15 = vector.broadcast %cst_9 : f32 to vector<256x128xf32>
      %c0_10 = arith.constant 0 : index
      %c0_11 = arith.constant 0 : index
      %16 = vector.load %arg7[%c0_10, %c0_11] : memref<256x128xf32, #tpu.memory_space<vmem>>, vector<256x128xf32>
      tpu.vector_store %arg7[%c0_10, %c0_11], %15 {strides = array<i32>} : memref<256x128xf32, #tpu.memory_space<vmem>>, vector<256x128xf32>,
    } else {
    }
    %c256_i32 = arith.constant 256 : i32
    %3 = arith.muli %arg1, %c256_i32 : i32
    %4 = tpu.assume_multiple %3, 256 : i32
    %5 = arith.index_cast %4 : i32 to index
    %c0 = arith.constant 0 : index
    %6 = vector.load %arg3[%5, %c0] : memref<256x128xbf16, #tpu.memory_space<vmem>>, vector<256x128xbf16>
    %c0_1 = arith.constant 0 : index
    %c0_2 = arith.constant 0 : index
    %7 = vector.load %arg7[%c0_1, %c0_2] : memref<256x128xf32, #tpu.memory_space<vmem>>, vector<256x128xf32>
    %c0_3 = arith.constant 0 : index
    %c0_4 = arith.constant 0 : index
    %8 = vector.load %arg2[%c0_3, %c0_4] : memref<256x256xbf16, #tpu.memory_space<vmem>>, vector<256x256xbf16>
    %cst = arith.constant dense<0.000000e+00> : vector<256x128xf32>
    %9 = tpu.matmul %8, %6, %cst {dimension_numbers = #tpu.dot_dimension_numbers<[1], [0], [0], [1], [0, 0, 1, 1], [], []>} : vector<256x256xbf16>, vector<256x128xbf16>, vector<256x128xf32> -> vector<256x128xf32>
    %10 = arith.addf %7, %9 : vector<256x128xf32>
    %c0_5 = arith.constant 0 : index
    %c0_6 = arith.constant 0 : index
    %11 = vector.load %arg7[%c0_5, %c0_6] : memref<256x128xf32, #tpu.memory_space<vmem>>, vector<256x128xf32>
    tpu.vector_store %arg7[%c0_5, %c0_6], %10 {strides = array<i32>} : memref<256x128xf32, #tpu.memory_space<vmem>>, vector<256x128xf32>,
    %c0_i32_7 = arith.constant 0 : i32
    %12 = arith.cmpi eq, %arg1, %c0_i32_7 : i32
    %13 = arith.extui %12 : i1 to i32
    %c0_i32_8 = arith.constant 0 : i32
    %14 = arith.cmpi ne, %13, %c0_i32_8 : i32
    scf.if %14 {
      %c0_9 = arith.constant 0 : index
      %c0_10 = arith.constant 0 : index
      %15 = vector.load %arg7[%c0_9, %c0_10] : memref<256x128xf32, #tpu.memory_space<vmem>>, vector<256x128xf32>
      %c0_11 = arith.constant 0 : index
      %c0_12 = arith.constant 0 : index
      %16 = vector.load %arg4[%c0_11, %c0_12] : memref<1x128xf32, #tpu.memory_space<vmem>>, vector<1x128xf32>
      %17 = vector.broadcast %16 : vector<1x128xf32> to vector<256x128xf32>
      %18 = arith.addf %15, %17 : vector<256x128xf32>
      %cst_13 = arith.constant 0.000000e+00 : f32
      %19 = vector.broadcast %cst_13 : f32 to vector<256x128xf32>
      %20 = arith.maximumf %18, %19 : vector<256x128xf32>
      %21 = arith.truncf %20 : vector<256x128xf32> to vector<256x128xbf16>
      %c0_14 = arith.constant 0 : index
      %c0_15 = arith.constant 0 : index
      %22 = vector.load %arg5[%c0_14, %c0_15] : memref<8x256xbf16, #tpu.memory_space<vmem>>, vector<8x256xbf16>
      %cst_16 = arith.constant dense<0.000000e+00> : vector<8x128xf32>
      %23 = tpu.matmul %22, %21, %cst_16 {dimension_numbers = #tpu.dot_dimension_numbers<[1], [0], [0], [1], [0, 0, 1, 1], [], []>} : vector<8x256xbf16>, vector<256x128xbf16>, vector<8x128xf32> -> vector<8x128xf32>
      %24 = vector.shape_cast %23 : vector<8x128xf32> to vector<1x8x128xf32>
      %c0_17 = arith.constant 0 : index
      %c0_18 = arith.constant 0 : index
      %c0_19 = arith.constant 0 : index
      %25 = vector.load %arg6[%c0_17, %c0_18, %c0_19] : memref<1x8x128xf32, #tpu.memory_space<vmem>>, vector<1x8x128xf32>
      tpu.vector_store %arg6[%c0_17, %c0_18, %c0_19], %24 {strides = array<i32>} : memref<1x8x128xf32, #tpu.memory_space<vmem>>, vector<1x8x128xf32>,
    } else {
    }
    return
  }
  func.func @transform_0(%arg0: i32, %arg1: i32) -> (i32, i32) {
    %c0_i32 = arith.constant 0 : i32
    return %arg0, %arg1 : i32, i32
  }
  func.func @transform_1(%arg0: i32, %arg1: i32) -> (i32, i32) {
    %c0_i32 = arith.constant 0 : i32
    %c0_i32_0 = arith.constant 0 : i32
    %c0_i32_1 = arith.constant 0 : i32
    return %c0_i32, %c0_i32_0 : i32, i32
  }
  func.func @transform_2(%arg0: i32, %arg1: i32) -> (i32, i32) {
    %c0_i32 = arith.constant 0 : i32
    %c0_i32_0 = arith.constant 0 : i32
    %c0_i32_1 = arith.constant 0 : i32
    return %c0_i32, %c0_i32_0 : i32, i32
  }
  func.func @transform_3(%arg0: i32, %arg1: i32) -> (i32, i32) {
    %c0_i32 = arith.constant 0 : i32
    %c0_i32_0 = arith.constant 0 : i32
    return %c0_i32, %arg0 : i32, i32
  }
  func.func @transform_4(%arg0: i32, %arg1: i32) -> (i32, i32, i32) {
    %c0_i32 = arith.constant 0 : i32
    %c0_i32_0 = arith.constant 0 : i32
    %c0_i32_1 = arith.constant 0 : i32
    return %arg0, %c0_i32, %c0_i32_0 : i32, i32, i32
  }
}

</mosaic_0001>

<bundles_post_ra>
// kernel: gnn_forward.3
= control target key start
LH: loop header
LB: loop body
LE: loop exit
PB: predicated region body
PF: predicated region fallthrough
CT: control target
= control target key end

     0   :  { %v192_v0 = vmov 0.0   ;;  %vm193_vm0 = vmmov 0   ;;  %s247_s1 = inlined_call_operand.vmem [shape: bf16[128,128], index: 1, kind: input, shape index: {}]   ;;  %s248_s0 = inlined_call_operand.vmem [shape: f32[1,8,128], index: 0, kind: input, shape index: {}]   ;;  %s249_s2 = inlined_call_operand.vmem [shape: f32[1,128], index: 2, kind: input, shape index: {}]   ;;  %s250_s3 = inlined_call_operand.vmem [shape: f32[8,128], index: 3, kind: output, shape index: {}]  }
   0x1   :  { %158 = vmatprep.subr.bf16.mxu0 %v192_v0  ;;  %v180_v1 = vld [vmem:[%s247_s1] sm:$0xff]   ;;  %174 = vmatprep.mubr.msk.bf16.mxu0 %vm193_vm0, %v192_v0  ;;  %v181_v2 = vld [vmem:[%s247_s1 + $0x8] sm:$0xff]   ;;  %v182_v3 = vld [vmem:[%s247_s1 + $0x10] sm:$0xff]  }
   0x2   :  { %159 = vmatpush3.bf16.msra.mxu0 %v180_v1  ;;  %v183_v4 = vld [vmem:[%s247_s1 + $0x18] sm:$0xff]   ;;  %v184_v5 = vld [vmem:[%s247_s1 + $0x20] sm:$0xff]   ;;  %v185_v6 = vld [vmem:[%s247_s1 + $0x28] sm:$0xff]  }
   0x3   :  { %160 = vmatprep.subr.bf16.mxu0 %v192_v0  ;;  %v186_v7 = vld [vmem:[%s247_s1 + $0x30] sm:$0xff]   ;;  %v187_v8 = vld [vmem:[%s247_s1 + $0x38] sm:$0xff]   ;;  %v15_v9 = vld [vmem:[%s248_s0] sm:$0xff] }
   0x4   :  { %v17_v10 = vpack.c.bf16 %v15_v9, %v15_v9  ;;  %v140_v11 = vld [vmem:[%s249_s2] ss:$0 sm:$0xff] }
   0x6   :  { %161 = vmatpush3.bf16.msra.mxu0 %v181_v2 }
   0x7   :  { %162 = vmatprep.subr.bf16.mxu0 %v192_v0 }
   0xa   :  { %163 = vmatpush3.bf16.msra.mxu0 %v182_v3 }
   0xb   :  { %164 = vmatprep.subr.bf16.mxu0 %v192_v0 }
   0xe   :  { %165 = vmatpush3.bf16.msra.mxu0 %v183_v4 }
   0xf   :  { %166 = vmatprep.subr.bf16.mxu0 %v192_v0 }
  0x12   :  { %167 = vmatpush3.bf16.msra.mxu0 %v184_v5 }
  0x13   :  { %168 = vmatprep.subr.bf16.mxu0 %v192_v0 }
  0x16   :  { %169 = vmatpush3.bf16.msra.mxu0 %v185_v6 }
  0x17   :  { %170 = vmatprep.subr.bf16.mxu0 %v192_v0 }
  0x1a   :  { %171 = vmatpush3.bf16.msra.mxu0 %v186_v7 }
  0x1b   :  { %172 = vmatprep.subr.bf16.mxu0 %v192_v0 }
  0x1e   :  { %173 = vmatpush3.bf16.msra.mxu0 %v187_v8 }
  0x21   :  { %175 = vmatmul.mubr.bf16.vlgmr.msra.gmra.mrb[0].mxu0 %v17_v10 }
  0xf4   :  { %v123_v12 = vpop.f32.mrb[0].mxu0 }
  0xf5   :  { %v124_v13 = vadd.f32 %v140_v11, %v123_v12  ;;  %v176_v14 = vpop.f32.mrb[1].mxu0 }
  0xf6   :  { %v126_v15 = vpop.f32.mrb[2].mxu0 }
  0xf7   :  { %v129_v16 = vsub.f32 0.0, %v124_v13  ;;  %v177_v17 = vpop.f32.mrb[3].mxu0 }
  0xf9   :  { %v130_v18 = vmul.f32 1.442695, %v129_v16 }
  0xfb   :  { %188 = vpow2.f32 %v130_v18 }
 0x105   :  { %v189_v19 = vpop.eup %188 }
 0x106   :  { %v132_v20 = vadd.f32 1.0, %v189_v19 }
 0x108   :  { %190 = vrcp.f32 %v132_v20 }
 0x112   :  { %v191_v21 = vpop.eup %190 }
 0x113   :  { %135 = vst [vmem:[%s250_s3] sm:$0xff] %v191_v21 }

// kernel: gnn_forward.2
= control target key start
LH: loop header
LB: loop body
LE: loop exit
PB: predicated region body
PF: predicated region fallthrough
CT: control target
= control target key end

     0   :  { %s1328_s1 = inlined_call_operand.vmem [shape: bf16[256,128], index: 1, kind: input, shape index: {}]   ;;  %s1329_s0 = inlined_call_operand.vmem [shape: bf16[256,256], index: 0, kind: input, shape index: {}]   ;;  %s1330_s3 = inlined_call_operand.vmem [shape: bf16[8,256], index: 3, kind: input, shape index: {}]   ;;  %s1331_s2 = inlined_call_operand.vmem [shape: f32[1,128], index: 2, kind: input, shape index: {}]   ;;  %s1332_s4 = inlined_call_operand.vmem [shape: f32[1,8,128], index: 4, kind: output, shape index: {}]  }
   0x1   :  { %v1014_v0 = vld [vmem:[%s1328_s1 + $0x40] sm:$0xff]   ;;  %v1016_v2 = vld [vmem:[%s1328_s1 + $0x48] sm:$0xff]   ;;  %v1018_v4 = vld [vmem:[%s1328_s1 + $0x50] sm:$0xff]  }
   0x2   :  { %v1015_v1 = vld [vmem:[%s1328_s1] sm:$0xff]   ;;  %864 = vmatprep.subr.bf16.mxu0 %v1014_v0  ;;  %998 = vmatprep.subr.bf16.mxu1 %v1014_v0  ;;  %v1017_v3 = vld [vmem:[%s1328_s1 + $0x8] sm:$0xff]   ;;  %v1019_v5 = vld [vmem:[%s1328_s1 + $0x10] sm:$0xff]  }
   0x3   :  { %865 = vmatpush3.bf16.msra.mxu0 %v1015_v1  ;;  %1006 = vmatpush3.bf16.msra.mxu1 %v1015_v1  ;;  %v1020_v6 = vld [vmem:[%s1328_s1 + $0x58] sm:$0xff]   ;;  %v1022_v8 = vld [vmem:[%s1328_s1 + $0x60] sm:$0xff]   ;;  %v1024_v10 = vld [vmem:[%s1328_s1 + $0x68] sm:$0xff]  }
   0x4   :  { %866 = vmatprep.subr.bf16.mxu0 %v1016_v2  ;;  %999 = vmatprep.subr.bf16.mxu1 %v1016_v2  ;;  %v1021_v7 = vld [vmem:[%s1328_s1 + $0x18] sm:$0xff]   ;;  %v1023_v9 = vld [vmem:[%s1328_s1 + $0x20] sm:$0xff]   ;;  %v1025_v12 = vld [vmem:[%s1328_s1 + $0x28] sm:$0xff]  }
   0x5   :  { %v1032_v11 = vld [vmem:[%s1329_s0 + $0x4] ss:$8 sps:$4 sm:$0xff]   ;;  %v1026_v13 = vld [vmem:[%s1328_s1 + $0x70] sm:$0xff]   ;;  %v1028_v15 = vld [vmem:[%s1328_s1 + $0x78] sm:$0xff]  }
   0x6   :  { %443 = vmatprep.mubr.bf16.mxu0 %v1032_v11  ;;  %v1027_v14 = vld [vmem:[%s1328_s1 + $0x30] sm:$0xff]   ;;  %v1029_v17 = vld [vmem:[%s1328_s1 + $0x38] sm:$0xff]   ;;  %v1030_v18 = vld [vmem:[%s1329_s0] ss:$8 sps:$4 sm:$0xff]  }
   0x7   :  { %867 = vmatpush3.bf16.msra.mxu0 %v1017_v3  ;;  %1007 = vmatpush3.bf16.msra.mxu1 %v1017_v3  ;;  %v1050_v16 = vld [vmem:[%s1329_s0 + $0x94] ss:$8 sps:$4 sm:$0xff]   ;;  %v1048_v20 = vld [vmem:[%s1329_s0 + $0x90] ss:$8 sps:$4 sm:$0xff]   ;;  %v1054_v21 = vld [vmem:[%s1329_s0 + $0xa4] ss:$8 sps:$4 sm:$0xff]  }
   0x8   :  { %868 = vmatprep.subr.bf16.mxu0 %v1018_v4  ;;  %1000 = vmatprep.subr.bf16.mxu1 %v1018_v4  ;;  %v1033_v19 = vld [vmem:[%s1329_s0 + $0x14] ss:$8 sps:$4 sm:$0xff]   ;;  %v1035_v22 = vld [vmem:[%s1329_s0 + $0x10] ss:$8 sps:$4 sm:$0xff]   ;;  %v1036_v23 = vld [vmem:[%s1329_s0 + $0x24] ss:$8 sps:$4 sm:$0xff]  }
   0x9   :  { %515 = vmatprep.mubr.bf16.mxu1 %v1050_v16  ;;  %v1056_v24 = vld [vmem:[%s1329_s0 + $0xa0] ss:$8 sps:$4 sm:$0xff]   ;;  %v1060_v25 = vld [vmem:[%s1329_s0 + $0xb4] ss:$8 sps:$4 sm:$0xff]   ;;  %v1062_v28 = vld [vmem:[%s1329_s0 + $0xb0] ss:$8 sps:$4 sm:$0xff]  }
   0xa   :  { %v1038_v26 = vld [vmem:[%s1329_s0 + $0x20] ss:$8 sps:$4 sm:$0xff]   ;;  %v1039_v27 = vld [vmem:[%s1329_s0 + $0x34] ss:$8 sps:$4 sm:$0xff]   ;;  %v1066_v29 = vld [vmem:[%s1329_s0 + $0xc4] ss:$8 sps:$4 sm:$0xff]  }
   0xb   :  { %869 = vmatpush3.bf16.msra.mxu0 %v1019_v5  ;;  %1008 = vmatpush3.bf16.msra.mxu1 %v1019_v5  ;;  %v1041_v30 = vld [vmem:[%s1329_s0 + $0x30] ss:$8 sps:$4 sm:$0xff]   ;;  %v1042_v31 = vld [vmem:[%s1329_s0 + $0x44] ss:$8 sps:$4 sm:$0xff]   ;;  %v1068_v32 = vld [vmem:[%s1329_s0 + $0xc0] ss:$8 sps:$4 sm:$0xff]  }
   0xc   :  { %870 = vmatprep.subr.bf16.mxu0 %v1020_v6  ;;  %1001 = vmatprep.subr.bf16.mxu1 %v1020_v6  ;;  %v1069_v33 = vld [vmem:[%s1329_s0 + $0xd4] ss:$8 sps:$4 sm:$0xff]   ;;  %v1044_v34 = vld [vmem:[%s1329_s0 + $0x40] ss:$8 sps:$4 sm:$0xff]   ;;  %v1071_v36 = vld [vmem:[%s1329_s0 + $0xd0] ss:$8 sps:$4 sm:$0xff]  }
   0xd   :  { %v1045_v35 = vld [vmem:[%s1329_s0 + $0x54] ss:$8 sps:$4 sm:$0xff]   ;;  %v1072_v37 = vld [vmem:[%s1329_s0 + $0xe4] ss:$8 sps:$4 sm:$0xff]   ;;  %v1047_v38 = vld [vmem:[%s1329_s0 + $0x50] ss:$8 sps:$4 sm:$0xff]  }
   0xe   :  { %v1051_v39 = vld [vmem:[%s1329_s0 + $0x64] ss:$8 sps:$4 sm:$0xff]   ;;  %v1074_v40 = vld [vmem:[%s1329_s0 + $0xe0] ss:$8 sps:$4 sm:$0xff]   ;;  %v1075_v41 = vld [vmem:[%s1329_s0 + $0xf4] ss:$8 sps:$4 sm:$0xff]  }
   0xf   :  { %871 = vmatpush3.bf16.msra.mxu0 %v1021_v7  ;;  %1009 = vmatpush3.bf16.msra.mxu1 %v1021_v7  ;;  %v1053_v42 = vld [vmem:[%s1329_s0 + $0x60] ss:$8 sps:$4 sm:$0xff]   ;;  %v1057_v43 = vld [vmem:[%s1329_s0 + $0x74] ss:$8 sps:$4 sm:$0xff]   ;;  %v1077_v44 = vld [vmem:[%s1329_s0 + $0xf0] ss:$8 sps:$4 sm:$0xff]  }
  0x10   :  { %872 = vmatprep.subr.bf16.mxu0 %v1022_v8  ;;  %1002 = vmatprep.subr.bf16.mxu1 %v1022_v8  ;;  %v1059_v45 = vld [vmem:[%s1329_s0 + $0x70] ss:$8 sps:$4 sm:$0xff]   ;;  %v1063_v46 = vld [vmem:[%s1329_s0 + $0x84] ss:$8 sps:$4 sm:$0xff]   ;;  %v1065_v47 = vld [vmem:[%s1329_s0 + $0x80] ss:$8 sps:$4 sm:$0xff]  }
  0x11   :  { %v1252_v48 = vld [vmem:[%s1330_s3] sm:$0xff] }
  0x12   :  { %v863_v49 = vcombine.high %v1252_v48, %v1252_v48  ;;  %v1259_v52 = vld [vmem:[%s1331_s2] ss:$0 sm:$0xff] }
  0x13   :  { %873 = vmatpush3.bf16.msra.mxu0 %v1023_v9  ;;  %1010 = vmatpush3.bf16.msra.mxu1 %v1023_v9 }
  0x14   :  { %874 = vmatprep.subr.bf16.mxu0 %v1024_v10  ;;  %1003 = vmatprep.subr.bf16.mxu1 %v1024_v10 }
  0x17   :  { %875 = vmatpush3.bf16.msra.mxu0 %v1025_v12  ;;  %1011 = vmatpush3.bf16.msra.mxu1 %v1025_v12 }
  0x18   :  { %876 = vmatprep.subr.bf16.mxu0 %v1026_v13  ;;  %1004 = vmatprep.subr.bf16.mxu1 %v1026_v13 }
  0x1b   :  { %877 = vmatpush3.bf16.msra.mxu0 %v1027_v14  ;;  %1012 = vmatpush3.bf16.msra.mxu1 %v1027_v14 }
  0x1c   :  { %878 = vmatprep.subr.bf16.mxu0 %v1028_v15  ;;  %1005 = vmatprep.subr.bf16.mxu1 %v1028_v15 }
  0x1f   :  { %879 = vmatpush3.bf16.msra.mxu0 %v1029_v17  ;;  %1013 = vmatpush3.bf16.msra.mxu1 %v1029_v17 }
  0x22   :  { %444 = vmatmul.mubr.bf16.vlgmr.msra.gmra.mrb[0].mxu0 %v1030_v18  ;;  %516 = vmatmul.mubr.bf16.vlgmr.msra.gmra.mrb[0].mxu1 %v1048_v20 }
  0x23   :  { %451 = vmatprep.mubr.bf16.mxu0 %v1033_v19  ;;  %523 = vmatprep.mubr.bf16.mxu1 %v1054_v21 }
  0x2a   :  { %452 = vmatmul.mubr.bf16.gmra.mrb[4].mxu0 %v1035_v22  ;;  %524 = vmatmul.mubr.bf16.gmra.mrb[4].mxu1 %v1056_v24 }
  0x2b   :  { %459 = vmatprep.mubr.bf16.mxu0 %v1036_v23  ;;  %531 = vmatprep.mubr.bf16.mxu1 %v1060_v25 }
  0x32   :  { %460 = vmatmul.mubr.bf16.gmra.mrb[8].mxu0 %v1038_v26  ;;  %532 = vmatmul.mubr.bf16.gmra.mrb[8].mxu1 %v1062_v28 }
  0x33   :  { %467 = vmatprep.mubr.bf16.mxu0 %v1039_v27  ;;  %539 = vmatprep.mubr.bf16.mxu1 %v1066_v29 }
  0x3a   :  { %468 = vmatmul.mubr.bf16.gmra.mrb[12].mxu0 %v1041_v30  ;;  %540 = vmatmul.mubr.bf16.gmra.mrb[12].mxu1 %v1068_v32 }
  0x3b   :  { %475 = vmatprep.mubr.bf16.mxu0 %v1042_v31  ;;  %547 = vmatprep.mubr.bf16.mxu1 %v1069_v33 }
  0x42   :  { %476 = vmatmul.mubr.bf16.gmra.mrb[16].mxu0 %v1044_v34  ;;  %548 = vmatmul.mubr.bf16.gmra.mrb[16].mxu1 %v1071_v36 }
  0x43   :  { %483 = vmatprep.mubr.bf16.mxu0 %v1045_v35  ;;  %555 = vmatprep.mubr.bf16.mxu1 %v1072_v37 }
  0x4a   :  { %484 = vmatmul.mubr.bf16.gmra.mrb[20].mxu0 %v1047_v38  ;;  %556 = vmatmul.mubr.bf16.gmra.mrb[20].mxu1 %v1074_v40 }
  0x4b   :  { %491 = vmatprep.mubr.bf16.mxu0 %v1051_v39  ;;  %563 = vmatprep.mubr.bf16.mxu1 %v1075_v41 }
  0x52   :  { %492 = vmatmul.mubr.bf16.gmra.mrb[24].mxu0 %v1053_v42  ;;  %564 = vmatmul.mubr.bf16.gmra.mrb[24].mxu1 %v1077_v44 }
  0x53   :  { %499 = vmatprep.mubr.bf16.mxu0 %v1057_v43  ;;  %798 = vmatprep.mubr.bf16.mxu1 %v863_v49 }
  0x5a   :  { %500 = vmatmul.mubr.bf16.gmra.mrb[28].mxu0 %v1059_v45 }
  0x5b   :  { %507 = vmatprep.mubr.bf16.mxu0 %v1063_v46 }
  0x62   :  { %508 = vmatmul.mubr.bf16.gmra.mrb[32].mxu0 %v1065_v47 }
  0xf5   :  { %v880_v50 = vpop.f32.mrb[0].mxu0  ;;  %v934_v53 = vpop.f32.mrb[0].mxu1 }
  0xf6   :  { %v881_v51 = vpop.f32.mrb[1].mxu0  ;;  %v935_v56 = vpop.f32.mrb[1].mxu1 }
  0xf7   :  { %v882_v54 = vadd.f32 %v881_v51, %v880_v50  ;;  %v883_v55 = vpop.f32.mrb[2].mxu0  ;;  %v936_v58 = vadd.f32 %v935_v56, %v934_v53  ;;  %v937_v59 = vpop.f32.mrb[2].mxu1 }
  0xf8   :  { %v884_v57 = vpop.f32.mrb[3].mxu0  ;;  %v938_v62 = vpop.f32.mrb[3].mxu1 }
  0xf9   :  { %v678_v60 = vadd.f32 %v882_v54, %v1259_v52  ;;  %v885_v61 = vadd.f32 %v884_v57, %v883_v55  ;;  %v696_v63 = vadd.f32 %v936_v58, %v1259_v52  ;;  %v939_v0 = vadd.f32 %v938_v62, %v937_v59 }
  0xfb   :  { %v679_v1 = vadd.f32 %v885_v61, %v1259_v52  ;;  %v728_v2 = vmax.f32 %v696_v63, 0.0  ;;  %v697_v3 = vadd.f32 %v939_v0, %v1259_v52  ;;  %v710_v4 = vmax.f32 %v678_v60, 0.0 }
  0xfd   :  { %v711_v5 = vmax.f32 %v679_v1, 0.0  ;;  %v886_v6 = vpop.f32.mrb[4].mxu0  ;;  %v729_v8 = vmax.f32 %v697_v3, 0.0  ;;  %v940_v9 = vpop.f32.mrb[4].mxu1 }
  0xfe   :  { %v887_v7 = vpop.f32.mrb[5].mxu0  ;;  %v941_v13 = vpop.f32.mrb[5].mxu1 }
  0xff   :  { %v1265_v10 = vpack.c.bf16 %v711_v5, %v710_v4  ;;  %v888_v11 = vadd.f32 %v887_v7, %v886_v6  ;;  %v889_v12 = vpop.f32.mrb[6].mxu0  ;;  %v942_v15 = vadd.f32 %v941_v13, %v940_v9  ;;  %v943_v16 = vpop.f32.mrb[6].mxu1  ;;  %v1267_v17 = vpack.c.bf16 %v729_v8, %v728_v2 }
 0x100   :  { %v890_v14 = vpop.f32.mrb[7].mxu0  ;;  %v944_v20 = vpop.f32.mrb[7].mxu1 }
 0x101   :  { %v680_v18 = vadd.f32 %v888_v11, %v1259_v52  ;;  %v891_v19 = vadd.f32 %v890_v14, %v889_v12  ;;  %v698_v21 = vadd.f32 %v942_v15, %v1259_v52  ;;  %v945_v22 = vadd.f32 %v944_v20, %v943_v16 }
 0x103   :  { %v681_v23 = vadd.f32 %v891_v19, %v1259_v52  ;;  %v730_v24 = vmax.f32 %v698_v21, 0.0  ;;  %v699_v25 = vadd.f32 %v945_v22, %v1259_v52  ;;  %v712_v26 = vmax.f32 %v680_v18, 0.0 }
 0x105   :  { %v713_v27 = vmax.f32 %v681_v23, 0.0  ;;  %v892_v28 = vpop.f32.mrb[8].mxu0  ;;  %v731_v30 = vmax.f32 %v699_v25, 0.0  ;;  %v946_v31 = vpop.f32.mrb[8].mxu1 }
 0x106   :  { %v893_v29 = vpop.f32.mrb[9].mxu0  ;;  %v947_v35 = vpop.f32.mrb[9].mxu1 }
 0x107   :  { %v1273_v32 = vpack.c.bf16 %v713_v27, %v712_v26  ;;  %v894_v33 = vadd.f32 %v893_v29, %v892_v28  ;;  %v895_v34 = vpop.f32.mrb[10].mxu0  ;;  %v948_v37 = vadd.f32 %v947_v35, %v946_v31  ;;  %v949_v38 = vpop.f32.mrb[10].mxu1  ;;  %v1275_v39 = vpack.c.bf16 %v731_v30, %v730_v24 }
 0x108   :  { %v896_v36 = vpop.f32.mrb[11].mxu0  ;;  %v950_v42 = vpop.f32.mrb[11].mxu1 }
 0x109   :  { %v682_v40 = vadd.f32 %v894_v33, %v1259_v52  ;;  %v897_v41 = vadd.f32 %v896_v36, %v895_v34  ;;  %v700_v43 = vadd.f32 %v948_v37, %v1259_v52  ;;  %v951_v44 = vadd.f32 %v950_v42, %v949_v38 }
 0x10b   :  { %v683_v45 = vadd.f32 %v897_v41, %v1259_v52  ;;  %v732_v46 = vmax.f32 %v700_v43, 0.0  ;;  %v701_v47 = vadd.f32 %v951_v44, %v1259_v52  ;;  %v714_v49 = vmax.f32 %v682_v40, 0.0 }
 0x10d   :  { %v715_v50 = vmax.f32 %v683_v45, 0.0  ;;  %v898_v51 = vpop.f32.mrb[12].mxu0  ;;  %v733_v54 = vmax.f32 %v701_v47, 0.0  ;;  %v952_v55 = vpop.f32.mrb[12].mxu1 }
 0x10e   :  { %v899_v53 = vpop.f32.mrb[13].mxu0  ;;  %v953_v59 = vpop.f32.mrb[13].mxu1 }
 0x10f   :  { %v1281_v56 = vpack.c.bf16 %v715_v50, %v714_v49  ;;  %v900_v57 = vadd.f32 %v899_v53, %v898_v51  ;;  %v901_v58 = vpop.f32.mrb[14].mxu0  ;;  %v954_v61 = vadd.f32 %v953_v59, %v952_v55  ;;  %v955_v62 = vpop.f32.mrb[14].mxu1  ;;  %v1283_v63 = vpack.c.bf16 %v733_v54, %v732_v46 }
 0x110   :  { %v902_v60 = vpop.f32.mrb[15].mxu0  ;;  %v956_v2 = vpop.f32.mrb[15].mxu1 }
 0x111   :  { %v684_v0 = vadd.f32 %v900_v57, %v1259_v52  ;;  %v903_v1 = vadd.f32 %v902_v60, %v901_v58  ;;  %v702_v3 = vadd.f32 %v954_v61, %v1259_v52  ;;  %v957_v4 = vadd.f32 %v956_v2, %v955_v62 }
 0x113   :  { %v685_v5 = vadd.f32 %v903_v1, %v1259_v52  ;;  %v734_v6 = vmax.f32 %v702_v3, 0.0  ;;  %v703_v7 = vadd.f32 %v957_v4, %v1259_v52  ;;  %v716_v8 = vmax.f32 %v684_v0, 0.0 }
 0x115   :  { %v717_v9 = vmax.f32 %v685_v5, 0.0  ;;  %v904_v11 = vpop.f32.mrb[16].mxu0  ;;  %v735_v13 = vmax.f32 %v703_v7, 0.0  ;;  %v958_v14 = vpop.f32.mrb[16].mxu1 }
 0x116   :  { %v905_v12 = vpop.f32.mrb[17].mxu0  ;;  %v959_v19 = vpop.f32.mrb[17].mxu1 }
 0x117   :  { %v1289_v15 = vpack.c.bf16 %v717_v9, %v716_v8  ;;  %v906_v16 = vadd.f32 %v905_v12, %v904_v11  ;;  %v907_v18 = vpop.f32.mrb[18].mxu0  ;;  %v960_v21 = vadd.f32 %v959_v19, %v958_v14  ;;  %v961_v22 = vpop.f32.mrb[18].mxu1  ;;  %v1291_v23 = vpack.c.bf16 %v735_v13, %v734_v6 }
 0x118   :  { %v908_v20 = vpop.f32.mrb[19].mxu0  ;;  %v962_v26 = vpop.f32.mrb[19].mxu1 }
 0x119   :  { %v686_v24 = vadd.f32 %v906_v16, %v1259_v52  ;;  %v909_v25 = vadd.f32 %v908_v20, %v907_v18  ;;  %v704_v27 = vadd.f32 %v960_v21, %v1259_v52  ;;  %v963_v28 = vadd.f32 %v962_v26, %v961_v22 }
 0x11b   :  { %v687_v29 = vadd.f32 %v909_v25, %v1259_v52  ;;  %v736_v30 = vmax.f32 %v704_v27, 0.0  ;;  %v705_v31 = vadd.f32 %v963_v28, %v1259_v52  ;;  %v718_v33 = vmax.f32 %v686_v24, 0.0 }
 0x11d   :  { %v719_v34 = vmax.f32 %v687_v29, 0.0  ;;  %v910_v35 = vpop.f32.mrb[20].mxu0  ;;  %v737_v37 = vmax.f32 %v705_v31, 0.0  ;;  %v964_v38 = vpop.f32.mrb[20].mxu1 }
 0x11e   :  { %v911_v36 = vpop.f32.mrb[21].mxu0  ;;  %v965_v43 = vpop.f32.mrb[21].mxu1 }
 0x11f   :  { %v1297_v40 = vpack.c.bf16 %v719_v34, %v718_v33  ;;  %v912_v41 = vadd.f32 %v911_v36, %v910_v35  ;;  %v913_v42 = vpop.f32.mrb[22].mxu0  ;;  %v966_v45 = vadd.f32 %v965_v43, %v964_v38  ;;  %v967_v46 = vpop.f32.mrb[22].mxu1  ;;  %v1299_v47 = vpack.c.bf16 %v737_v37, %v736_v30 }
 0x120   :  { %v914_v44 = vpop.f32.mrb[23].mxu0  ;;  %v968_v51 = vpop.f32.mrb[23].mxu1 }
 0x121   :  { %v688_v49 = vadd.f32 %v912_v41, %v1259_v52  ;;  %v915_v50 = vadd.f32 %v914_v44, %v913_v42  ;;  %v706_v53 = vadd.f32 %v966_v45, %v1259_v52  ;;  %v969_v54 = vadd.f32 %v968_v51, %v967_v46 }
 0x123   :  { %v689_v55 = vadd.f32 %v915_v50, %v1259_v52  ;;  %v738_v57 = vmax.f32 %v706_v53, 0.0  ;;  %v707_v58 = vadd.f32 %v969_v54, %v1259_v52  ;;  %v720_v59 = vmax.f32 %v688_v49, 0.0 }
 0x125   :  { %v721_v60 = vmax.f32 %v689_v55, 0.0  ;;  %v916_v61 = vpop.f32.mrb[24].mxu0  ;;  %v739_v0 = vmax.f32 %v707_v58, 0.0  ;;  %v970_v1 = vpop.f32.mrb[24].mxu1 }
 0x126   :  { %v917_v62 = vpop.f32.mrb[25].mxu0  ;;  %v971_v5 = vpop.f32.mrb[25].mxu1 }
 0x127   :  { %v747_v2 = vpack.c.bf16 %v721_v60, %v720_v59  ;;  %v918_v3 = vadd.f32 %v917_v62, %v916_v61  ;;  %v919_v4 = vpop.f32.mrb[26].mxu0  ;;  %v972_v7 = vadd.f32 %v971_v5, %v970_v1  ;;  %v973_v8 = vpop.f32.mrb[26].mxu1  ;;  %v756_v9 = vpack.c.bf16 %v739_v0, %v738_v57 }
 0x128   :  { %v920_v6 = vpop.f32.mrb[27].mxu0  ;;  %v974_v13 = vpop.f32.mrb[27].mxu1 }
 0x129   :  { %v690_v11 = vadd.f32 %v918_v3, %v1259_v52  ;;  %v921_v12 = vadd.f32 %v920_v6, %v919_v4  ;;  %v708_v14 = vadd.f32 %v972_v7, %v1259_v52  ;;  %v975_v16 = vadd.f32 %v974_v13, %v973_v8 }
 0x12b   :  { %v691_v18 = vadd.f32 %v921_v12, %v1259_v52  ;;  %v740_v19 = vmax.f32 %v708_v14, 0.0  ;;  %v709_v20 = vadd.f32 %v975_v16, %v1259_v52  ;;  %v722_v21 = vmax.f32 %v690_v11, 0.0 }
 0x12d   :  { %v723_v22 = vmax.f32 %v691_v18, 0.0  ;;  %v922_v24 = vpop.f32.mrb[28].mxu0  ;;  %v741_v26 = vmax.f32 %v709_v20, 0.0 }
 0x12e   :  { %v923_v25 = vpop.f32.mrb[29].mxu0 }
 0x12f   :  { %v748_v27 = vpack.c.bf16 %v723_v22, %v722_v21  ;;  %v924_v28 = vadd.f32 %v923_v25, %v922_v24  ;;  %v925_v29 = vpop.f32.mrb[30].mxu0  ;;  %v757_v31 = vpack.c.bf16 %v741_v26, %v740_v19 }
 0x130   :  { %v926_v30 = vpop.f32.mrb[31].mxu0 }
 0x131   :  { %v692_v33 = vadd.f32 %v924_v28, %v1259_v52  ;;  %v927_v34 = vadd.f32 %v926_v30, %v925_v29 }
 0x133   :  { %v693_v35 = vadd.f32 %v927_v34, %v1259_v52  ;;  %v724_v36 = vmax.f32 %v692_v33, 0.0 }
 0x135   :  { %v725_v37 = vmax.f32 %v693_v35, 0.0  ;;  %v928_v38 = vpop.f32.mrb[32].mxu0 }
 0x136   :  { %v929_v41 = vpop.f32.mrb[33].mxu0 }
 0x137   :  { %v749_v42 = vpack.c.bf16 %v725_v37, %v724_v36  ;;  %v930_v43 = vadd.f32 %v929_v41, %v928_v38  ;;  %v931_v44 = vpop.f32.mrb[34].mxu0 }
 0x138   :  { %v932_v45 = vpop.f32.mrb[35].mxu0 }
 0x139   :  { %v694_v46 = vadd.f32 %v930_v43, %v1259_v52  ;;  %v933_v49 = vadd.f32 %v932_v45, %v931_v44 }
 0x13b   :  { %v695_v50 = vadd.f32 %v933_v49, %v1259_v52  ;;  %v726_v51 = vmax.f32 %v694_v46, 0.0  ;;  %v862_v52 = vcombine.low %v1252_v48, %v1252_v48 }
 0x13d   :  { %v727_v53 = vmax.f32 %v695_v50, 0.0 }
 0x13f   :  { %v750_v54 = vpack.c.bf16 %v727_v53, %v726_v51 }
 0x141   :  { %976 = vmatprep.subr.bf16.mxu1 %v750_v54 }
 0x142   :  { %977 = vmatpush3.bf16.msra.mxu1 %v1265_v10 }
 0x143   :  { %978 = vmatprep.subr.bf16.mxu1 %v1267_v17 }
 0x146   :  { %979 = vmatpush3.bf16.msra.mxu1 %v1273_v32 }
 0x147   :  { %980 = vmatprep.subr.bf16.mxu1 %v1275_v39 }
 0x14a   :  { %981 = vmatpush3.bf16.msra.mxu1 %v1281_v56 }
 0x14b   :  { %982 = vmatprep.subr.bf16.mxu1 %v1283_v63 }
 0x14e   :  { %983 = vmatpush3.bf16.msra.mxu1 %v1289_v15 }
 0x14f   :  { %984 = vmatprep.subr.bf16.mxu1 %v1291_v23 }
 0x152   :  { %985 = vmatpush3.bf16.msra.mxu1 %v1297_v40 }
 0x153   :  { %986 = vmatprep.subr.bf16.mxu1 %v1299_v47 }
 0x156   :  { %987 = vmatpush3.bf16.msra.mxu1 %v747_v2 }
 0x157   :  { %988 = vmatprep.subr.bf16.mxu1 %v756_v9 }
 0x15a   :  { %989 = vmatpush3.bf16.msra.mxu1 %v748_v27 }
 0x15b   :  { %990 = vmatprep.subr.bf16.mxu1 %v757_v31 }
 0x15e   :  { %991 = vmatpush3.bf16.msra.mxu1 %v749_v42 }
 0x161   :  { %799 = vmatmul.mubr.bf16.vlgmr.msra.gmra.mrb[28].mxu1 %v862_v52 }
 0x234   :  { %v992_v10 = vpop.f32.mrb[28].mxu1 }
 0x235   :  { %v993_v17 = vpop.f32.mrb[29].mxu1 }
 0x236   :  { %v994_v32 = vadd.f32 %v993_v17, %v992_v10  ;;  %v995_v39 = vpop.f32.mrb[30].mxu1 }
 0x237   :  { %v996_v56 = vpop.f32.mrb[31].mxu1 }
 0x238   :  { %806 = vst [vmem:[%s1332_s4] sm:$0xff] %v994_v32 }

</bundles_post_ra>
